<compile_context>
chip_gen: v7x
topology: tpu7x:2x2x1
jax: 0.10.0
libtpu: 0.0.40
codegen_flags: <defaults>
</compile_context>

<pallas_src>
import functools

import jax
import jax.numpy as jnp
from jax.experimental import pallas as pl
from jax.experimental.pallas import tpu as pltpu

LANE = 128  # TPU lane width


def _round_up(n, m):
    return ((n + m - 1) // m) * m


def _pad2(a, rows, cols):
    r, c = a.shape
    return jnp.pad(a, ((0, rows - r), (0, cols - c)))


# ----------------------------------------------------------------------------- kernel
def dqn2_kernel(x_ref,
                w1_ref, b1_ref,
                w2_ref, b2_ref,
                w3_ref, b3_ref,
                w4_ref, b4_ref,
                w5_ref, b5_ref,
                o_ref):
    # fc1 + relu   (bf16 MXU inputs, f32 accumulation; bias/ReLU in f32)
    h = jnp.dot(x_ref[...], w1_ref[...], preferred_element_type=jnp.float32) + b1_ref[...]
    h = jnp.maximum(h, 0.0)
    # dropout(0.5) -> identity in eval mode
    # fc2 + relu
    h = jnp.dot(h.astype(jnp.bfloat16), w2_ref[...],
                preferred_element_type=jnp.float32) + b2_ref[...]
    h = jnp.maximum(h, 0.0)
    # fc3 + relu
    h = jnp.dot(h.astype(jnp.bfloat16), w3_ref[...],
                preferred_element_type=jnp.float32) + b3_ref[...]
    h = jnp.maximum(h, 0.0)
    # dropout(0.5) -> identity in eval mode
    # fc4 + relu   (output padded 64→128; pad columns stay exactly 0 through the ReLU)
    h = jnp.dot(h.astype(jnp.bfloat16), w4_ref[...],
                preferred_element_type=jnp.float32) + b4_ref[...]
    h = jnp.maximum(h, 0.0)
    # fc5 (no activation) — lane-dense 128-wide output, cols 9..127 are exact zeros
    o = jnp.dot(h.astype(jnp.bfloat16), w5_ref[...],
                preferred_element_type=jnp.float32) + b5_ref[...]
    o_ref[...] = o.astype(o_ref.dtype)   # bf16 store: halves the output HBM stream


# ----------------------------------------------------------------------------- params
def prepare_params(params):
    """One-time pad + bf16 cast of the weights/biases (hoisted out of the forward).

    params: list of (W (in,out) f32, b (1,out) f32), unpadded.
    Returns a flat tuple (w1,b1,...,w5,b5) with output dims padded to multiples of 128
    (pad entries are exact zeros). fc1 keeps K=9; fc5 keeps K padded to 128 to match the
    padded fc4 output.
    """
    dims_p = [(9, 256), (256, 128), (128, 128), (128, 128), (128, 128)]
    flat = []
    for (w, b), (kp, npad) in zip(params, dims_p):
        flat.append(_pad2(w, kp, npad).astype(jnp.bfloat16))   # MXU input
        flat.append(_pad2(b, 1, npad).astype(jnp.float32))     # f32 bias (pad cols = 0)
    return tuple(flat)


# ----------------------------------------------------------------------------- tiling
def _choose_tiling(B, tile_b_max, min_steps=2):
    """Pick (tile_b, b_pad): tile_b multiple of 16, >=2 grid steps when batch allows
    (so the 'parallel' axis can span both v7x TensorCores), minimal batch overshoot."""
    b16 = _round_up(max(B, 16), 16)
    tile_b = min(tile_b_max, b16)
    if (b16 // tile_b) < min_steps and b16 >= min_steps * 16:
        tile_b = _round_up(-(-b16 // min_steps), 16)
    b_pad = _round_up(b16, tile_b)
    return tile_b, b_pad


# ----------------------------------------------------------------------------- forward
@functools.partial(jax.jit, static_argnames=("tile_b_max",))
def dqn2_forward(x, prepared, tile_b_max=2048):
    """x: (B, 9) float32. prepared: output of prepare_params()."""
    B, f_in = x.shape
    assert f_in == 9

    tile_b, b_pad = _choose_tiling(B, tile_b_max)
    # batch pad only (no lane pad of x): block last dim == full array dim (9) is legal
    x_p = jnp.pad(x, ((0, b_pad - B), (0, 0))).astype(jnp.bfloat16)

    grid = (b_pad // tile_b,)

    x_spec = pl.BlockSpec((tile_b, f_in), lambda i: (i, 0))
    out_spec = pl.BlockSpec((tile_b, LANE), lambda i: (i, 0))

    def const_spec(shape):
        # same block every grid step -> stays VMEM-resident, no re-DMA per step
        return pl.BlockSpec(shape, lambda i: (0, 0))

    in_specs = [x_spec] + [const_spec(a.shape) for a in prepared]

    # padded-MXU flops (hardware executes 128-granular K/N regardless of logical 9/64)
    flops = 2 * b_pad * (128 * 256 + 256 * 128 + 128 * 128 + 128 * 128 + 128 * 128)
    bytes_accessed = (x_p.size * x_p.dtype.itemsize
                      + sum(int(a.size) * a.dtype.itemsize for a in prepared)
                      + b_pad * LANE * 2)   # bf16 output

    out = pl.pallas_call(
        dqn2_kernel,
        out_shape=jax.ShapeDtypeStruct((b_pad, LANE), jnp.bfloat16),
        grid=grid,
        in_specs=in_specs,
        out_specs=out_spec,
        compiler_params=pltpu.CompilerParams(
            dimension_semantics=("parallel",),      # shard batch tiles across TCs (v7x)
            vmem_limit_bytes=32 * 1024 * 1024,      # plenty; working set is a few MiB
        ),
        cost_estimate=pl.CostEstimate(flops=flops, transcendentals=0,
                                      bytes_accessed=bytes_accessed),
    )(x_p, *prepared)

    return out[:B, :9].astype(jnp.float32)


# ----------------------------------------------------------------------------- setup / reference
def init_params(key):
    """Deterministic PyTorch-style init: U(-1/sqrt(fan_in), 1/sqrt(fan_in)).
    Weights stored as (in, out) == transpose of nn.Linear's (out, in)."""
    dims = [(9, 256), (256, 128), (128, 128), (128, 64), (64, 9)]
    params = []
    for (fan_in, fan_out) in dims:
        key, kw, kb = jax.random.split(key, 3)
        bound = 1.0 / jnp.sqrt(jnp.float32(fan_in))
        w = jax.random.uniform(kw, (fan_in, fan_out), jnp.float32, -bound, bound)
        b = jax.random.uniform(kb, (1, fan_out), jnp.float32, -bound, bound)
        params.append((w, b))
    return params


def reference_forward_bf16(x, params):
    """Pure-JAX reference matching the kernel numerics (bf16 dot inputs, f32 accum)."""
    h = x.astype(jnp.bfloat16)
    for i, (w, b) in enumerate(params):
        h = jnp.dot(h, w.astype(jnp.bfloat16), preferred_element_type=jnp.float32) + b
        if i < len(params) - 1:
            h = jnp.maximum(h, 0.0)
            h = h.astype(jnp.bfloat16)
    return h


def reference_forward_f32(x, params):
    """Pure-f32 reference == the PyTorch module in eval mode."""
    h = x
    for i, (w, b) in enumerate(params):
        h = h @ w + b
        if i < len(params) - 1:
            h = jnp.maximum(h, 0.0)
    return h


if __name__ == "__main__":
    key = jax.random.PRNGKey(0)
    params = init_params(key)
    prepared = prepare_params(params)

    ok = True
    for batch in (8, 33):   # single-step grid and 2-step grid (non-multiple-of-16 batch)
        key, kx = jax.random.split(key)
        x = jax.random.normal(kx, (batch, 9), jnp.float32)

        out = dqn2_forward(x, prepared)
        out = jax.block_until_ready(out)

        ref_matched = reference_forward_bf16(x, params)   # same bf16/f32 mixed path
        ref_f32 = reference_forward_f32(x, params)        # original module semantics

        assert out.shape == (batch, 9), out.shape
        # bf16 output store adds one rounding step vs the f32-accum reference
        assert jnp.allclose(out, ref_matched, atol=1e-2, rtol=1e-2), \
            f"mismatch vs bf16-matched JAX reference (batch={batch})"
        assert float(jnp.max(jnp.abs(out - ref_f32))) < 1e-1, \
            f"gross mismatch vs f32 reference (batch={batch})"
        ok = ok and True

    if ok:
        print("KERNEL_OK")
</pallas_src>

<mosaic_0001>
module attributes {stable_mosaic.version = 11 : i64} {
  func.func @dqn2_kernel(%arg0: i32, %arg1: memref<16x9xbf16, #tpu.memory_space<vmem>>, %arg2: memref<9x256xbf16, #tpu.memory_space<vmem>>, %arg3: memref<1x256xf32, #tpu.memory_space<vmem>>, %arg4: memref<256x128xbf16, #tpu.memory_space<vmem>>, %arg5: memref<1x128xf32, #tpu.memory_space<vmem>>, %arg6: memref<128x128xbf16, #tpu.memory_space<vmem>>, %arg7: memref<1x128xf32, #tpu.memory_space<vmem>>, %arg8: memref<128x128xbf16, #tpu.memory_space<vmem>>, %arg9: memref<1x128xf32, #tpu.memory_space<vmem>>, %arg10: memref<128x128xbf16, #tpu.memory_space<vmem>>, %arg11: memref<1x128xf32, #tpu.memory_space<vmem>>, %arg12: memref<16x128xbf16, #tpu.memory_space<vmem>>) attributes {dimension_semantics = [#tpu.dimension_semantics<parallel>], iteration_bounds = array<i64: 1>, scalar_prefetch = 0 : i64, scratch_operands = 0 : i64, tpu.core_type = #tpu.core_type<tc>, window_params = [{transform_indices = @transform_0, window_bounds = array<i64: 16, 9>}, {pipeline_mode = #tpu.pipeline_mode<synchronous>, transform_indices = @transform_1, window_bounds = array<i64: 9, 256>}, {pipeline_mode = #tpu.pipeline_mode<synchronous>, transform_indices = @transform_2, window_bounds = array<i64: 1, 256>}, {pipeline_mode = #tpu.pipeline_mode<synchronous>, transform_indices = @transform_3, window_bounds = array<i64: 256, 128>}, {pipeline_mode = #tpu.pipeline_mode<synchronous>, transform_indices = @transform_4, window_bounds = array<i64: 1, 128>}, {pipeline_mode = #tpu.pipeline_mode<synchronous>, transform_indices = @transform_5, window_bounds = array<i64: 128, 128>}, {pipeline_mode = #tpu.pipeline_mode<synchronous>, transform_indices = @transform_6, window_bounds = array<i64: 1, 128>}, {pipeline_mode = #tpu.pipeline_mode<synchronous>, transform_indices = @transform_7, window_bounds = array<i64: 128, 128>}, {pipeline_mode = #tpu.pipeline_mode<synchronous>, transform_indices = @transform_8, window_bounds = array<i64: 1, 128>}, {pipeline_mode = #tpu.pipeline_mode<synchronous>, transform_indices = @transform_9, window_bounds = array<i64: 128, 128>}, {pipeline_mode = #tpu.pipeline_mode<synchronous>, transform_indices = @transform_10, window_bounds = array<i64: 1, 128>}, {transform_indices = @transform_11, window_bounds = array<i64: 16, 128>}]} {
    %c0 = arith.constant 0 : index
    %c0_0 = arith.constant 0 : index
    %0 = vector.load %arg1[%c0, %c0_0] : memref<16x9xbf16, #tpu.memory_space<vmem>>, vector<16x9xbf16>
    %c0_1 = arith.constant 0 : index
    %c0_2 = arith.constant 0 : index
    %1 = vector.load %arg2[%c0_1, %c0_2] : memref<9x256xbf16, #tpu.memory_space<vmem>>, vector<9x256xbf16>
    %cst = arith.constant dense<0.000000e+00> : vector<16x256xf32>
    %2 = tpu.matmul %0, %1, %cst {dimension_numbers = #tpu.dot_dimension_numbers<[1], [0], [0], [1], [0, 0, 1, 1], [], []>} : vector<16x9xbf16>, vector<9x256xbf16>, vector<16x256xf32> -> vector<16x256xf32>
    %c0_3 = arith.constant 0 : index
    %c0_4 = arith.constant 0 : index
    %3 = vector.load %arg3[%c0_3, %c0_4] : memref<1x256xf32, #tpu.memory_space<vmem>>, vector<1x256xf32>
    %4 = vector.broadcast %3 : vector<1x256xf32> to vector<16x256xf32>
    %5 = arith.addf %2, %4 : vector<16x256xf32>
    %cst_5 = arith.constant 0.000000e+00 : f32
    %6 = vector.broadcast %cst_5 : f32 to vector<16x256xf32>
    %7 = arith.maximumf %5, %6 : vector<16x256xf32>
    %8 = arith.truncf %7 : vector<16x256xf32> to vector<16x256xbf16>
    %c0_6 = arith.constant 0 : index
    %c0_7 = arith.constant 0 : index
    %9 = vector.load %arg4[%c0_6, %c0_7] : memref<256x128xbf16, #tpu.memory_space<vmem>>, vector<256x128xbf16>
    %cst_8 = arith.constant dense<0.000000e+00> : vector<16x128xf32>
    %10 = tpu.matmul %8, %9, %cst_8 {dimension_numbers = #tpu.dot_dimension_numbers<[1], [0], [0], [1], [0, 0, 1, 1], [], []>} : vector<16x256xbf16>, vector<256x128xbf16>, vector<16x128xf32> -> vector<16x128xf32>
    %c0_9 = arith.constant 0 : index
    %c0_10 = arith.constant 0 : index
    %11 = vector.load %arg5[%c0_9, %c0_10] : memref<1x128xf32, #tpu.memory_space<vmem>>, vector<1x128xf32>
    %12 = vector.broadcast %11 : vector<1x128xf32> to vector<16x128xf32>
    %13 = arith.addf %10, %12 : vector<16x128xf32>
    %cst_11 = arith.constant 0.000000e+00 : f32
    %14 = vector.broadcast %cst_11 : f32 to vector<16x128xf32>
    %15 = arith.maximumf %13, %14 : vector<16x128xf32>
    %16 = arith.truncf %15 : vector<16x128xf32> to vector<16x128xbf16>
    %c0_12 = arith.constant 0 : index
    %c0_13 = arith.constant 0 : index
    %17 = vector.load %arg6[%c0_12, %c0_13] : memref<128x128xbf16, #tpu.memory_space<vmem>>, vector<128x128xbf16>
    %cst_14 = arith.constant dense<0.000000e+00> : vector<16x128xf32>
    %18 = tpu.matmul %16, %17, %cst_14 {dimension_numbers = #tpu.dot_dimension_numbers<[1], [0], [0], [1], [0, 0, 1, 1], [], []>} : vector<16x128xbf16>, vector<128x128xbf16>, vector<16x128xf32> -> vector<16x128xf32>
    %c0_15 = arith.constant 0 : index
    %c0_16 = arith.constant 0 : index
    %19 = vector.load %arg7[%c0_15, %c0_16] : memref<1x128xf32, #tpu.memory_space<vmem>>, vector<1x128xf32>
    %20 = vector.broadcast %19 : vector<1x128xf32> to vector<16x128xf32>
    %21 = arith.addf %18, %20 : vector<16x128xf32>
    %cst_17 = arith.constant 0.000000e+00 : f32
    %22 = vector.broadcast %cst_17 : f32 to vector<16x128xf32>
    %23 = arith.maximumf %21, %22 : vector<16x128xf32>
    %24 = arith.truncf %23 : vector<16x128xf32> to vector<16x128xbf16>
    %c0_18 = arith.constant 0 : index
    %c0_19 = arith.constant 0 : index
    %25 = vector.load %arg8[%c0_18, %c0_19] : memref<128x128xbf16, #tpu.memory_space<vmem>>, vector<128x128xbf16>
    %cst_20 = arith.constant dense<0.000000e+00> : vector<16x128xf32>
    %26 = tpu.matmul %24, %25, %cst_20 {dimension_numbers = #tpu.dot_dimension_numbers<[1], [0], [0], [1], [0, 0, 1, 1], [], []>} : vector<16x128xbf16>, vector<128x128xbf16>, vector<16x128xf32> -> vector<16x128xf32>
    %c0_21 = arith.constant 0 : index
    %c0_22 = arith.constant 0 : index
    %27 = vector.load %arg9[%c0_21, %c0_22] : memref<1x128xf32, #tpu.memory_space<vmem>>, vector<1x128xf32>
    %28 = vector.broadcast %27 : vector<1x128xf32> to vector<16x128xf32>
    %29 = arith.addf %26, %28 : vector<16x128xf32>
    %cst_23 = arith.constant 0.000000e+00 : f32
    %30 = vector.broadcast %cst_23 : f32 to vector<16x128xf32>
    %31 = arith.maximumf %29, %30 : vector<16x128xf32>
    %32 = arith.truncf %31 : vector<16x128xf32> to vector<16x128xbf16>
    %c0_24 = arith.constant 0 : index
    %c0_25 = arith.constant 0 : index
    %33 = vector.load %arg10[%c0_24, %c0_25] : memref<128x128xbf16, #tpu.memory_space<vmem>>, vector<128x128xbf16>
    %cst_26 = arith.constant dense<0.000000e+00> : vector<16x128xf32>
    %34 = tpu.matmul %32, %33, %cst_26 {dimension_numbers = #tpu.dot_dimension_numbers<[1], [0], [0], [1], [0, 0, 1, 1], [], []>} : vector<16x128xbf16>, vector<128x128xbf16>, vector<16x128xf32> -> vector<16x128xf32>
    %c0_27 = arith.constant 0 : index
    %c0_28 = arith.constant 0 : index
    %35 = vector.load %arg11[%c0_27, %c0_28] : memref<1x128xf32, #tpu.memory_space<vmem>>, vector<1x128xf32>
    %36 = vector.broadcast %35 : vector<1x128xf32> to vector<16x128xf32>
    %37 = arith.addf %34, %36 : vector<16x128xf32>
    %38 = arith.truncf %37 : vector<16x128xf32> to vector<16x128xbf16>
    %c0_29 = arith.constant 0 : index
    %c0_30 = arith.constant 0 : index
    %39 = vector.load %arg12[%c0_29, %c0_30] : memref<16x128xbf16, #tpu.memory_space<vmem>>, vector<16x128xbf16>
    tpu.vector_store %arg12[%c0_29, %c0_30], %38 {strides = array<i32>} : memref<16x128xbf16, #tpu.memory_space<vmem>>, vector<16x128xbf16>,
    return
  }
  func.func @transform_0(%arg0: i32) -> (i32, i32) {
    %c0_i32 = arith.constant 0 : i32
    %c0_i32_0 = arith.constant 0 : i32
    return %arg0, %c0_i32 : i32, i32
  }
  func.func @transform_1(%arg0: i32) -> (i32, i32) {
    %c0_i32 = arith.constant 0 : i32
    %c0_i32_0 = arith.constant 0 : i32
    %c0_i32_1 = arith.constant 0 : i32
    return %c0_i32, %c0_i32_0 : i32, i32
  }
  func.func @transform_2(%arg0: i32) -> (i32, i32) {
    %c0_i32 = arith.constant 0 : i32
    %c0_i32_0 = arith.constant 0 : i32
    %c0_i32_1 = arith.constant 0 : i32
    return %c0_i32, %c0_i32_0 : i32, i32
  }
  func.func @transform_3(%arg0: i32) -> (i32, i32) {
    %c0_i32 = arith.constant 0 : i32
    %c0_i32_0 = arith.constant 0 : i32
    %c0_i32_1 = arith.constant 0 : i32
    return %c0_i32, %c0_i32_0 : i32, i32
  }
  func.func @transform_4(%arg0: i32) -> (i32, i32) {
    %c0_i32 = arith.constant 0 : i32
    %c0_i32_0 = arith.constant 0 : i32
    %c0_i32_1 = arith.constant 0 : i32
    return %c0_i32, %c0_i32_0 : i32, i32
  }
  func.func @transform_5(%arg0: i32) -> (i32, i32) {
    %c0_i32 = arith.constant 0 : i32
    %c0_i32_0 = arith.constant 0 : i32
    %c0_i32_1 = arith.constant 0 : i32
    return %c0_i32, %c0_i32_0 : i32, i32
  }
  func.func @transform_6(%arg0: i32) -> (i32, i32) {
    %c0_i32 = arith.constant 0 : i32
    %c0_i32_0 = arith.constant 0 : i32
    %c0_i32_1 = arith.constant 0 : i32
    return %c0_i32, %c0_i32_0 : i32, i32
  }
  func.func @transform_7(%arg0: i32) -> (i32, i32) {
    %c0_i32 = arith.constant 0 : i32
    %c0_i32_0 = arith.constant 0 : i32
    %c0_i32_1 = arith.constant 0 : i32
    return %c0_i32, %c0_i32_0 : i32, i32
  }
  func.func @transform_8(%arg0: i32) -> (i32, i32) {
    %c0_i32 = arith.constant 0 : i32
    %c0_i32_0 = arith.constant 0 : i32
    %c0_i32_1 = arith.constant 0 : i32
    return %c0_i32, %c0_i32_0 : i32, i32
  }
  func.func @transform_9(%arg0: i32) -> (i32, i32) {
    %c0_i32 = arith.constant 0 : i32
    %c0_i32_0 = arith.constant 0 : i32
    %c0_i32_1 = arith.constant 0 : i32
    return %c0_i32, %c0_i32_0 : i32, i32
  }
  func.func @transform_10(%arg0: i32) -> (i32, i32) {
    %c0_i32 = arith.constant 0 : i32
    %c0_i32_0 = arith.constant 0 : i32
    %c0_i32_1 = arith.constant 0 : i32
    return %c0_i32, %c0_i32_0 : i32, i32
  }
  func.func @transform_11(%arg0: i32) -> (i32, i32) {
    %c0_i32 = arith.constant 0 : i32
    %c0_i32_0 = arith.constant 0 : i32
    return %arg0, %c0_i32 : i32, i32
  }
}

</mosaic_0001>

<bundles_post_ra>
// kernel: dqn2_forward.1
= control target key start
LH: loop header
LB: loop body
LE: loop exit
PB: predicated region body
PF: predicated region fallthrough
CT: control target
= control target key end

     0   :  { %16 = vsyncpa [#allocation3], 0  ;;  %s1239_s0 = inlined_call_operand.vmem [shape: bf16[16,9], index: 0, kind: input, shape index: {}]   ;;  %s1240_s1 = inlined_call_operand.vmem [shape: bf16[9,256], index: 1, kind: input, shape index: {}]   ;;  %s1241_s2 = inlined_call_operand.vmem [shape: f32[1,256], index: 2, kind: input, shape index: {}]   ;;  %s1242_s3 = inlined_call_operand.hbm [shape: bf16[256,128], index: 3, kind: input, shape index: {}]   ;;  %s1243_s4 = inlined_call_operand.vmem [shape: f32[1,128], index: 4, kind: input, shape index: {}]   ;;  %s1244_s5 = inlined_call_operand.hbm [shape: bf16[128,128], index: 5, kind: input, shape index: {}]   ;;  %s1245_s6 = inlined_call_operand.vmem [shape: f32[1,128], index: 6, kind: input, shape index: {}]   ;;  %s1246_s7 = inlined_call_operand.hbm [shape: bf16[128,128], index: 7, kind: input, shape index: {}]   ;;  %s1247_s8 = inlined_call_operand.vmem [shape: f32[1,128], index: 8, kind: input, shape index: {}]   ;;  %s1248_s9 = inlined_call_operand.hbm [shape: bf16[128,128], index: 9, kind: input, shape index: {}]   ;;  %s1249_s10 = inlined_call_operand.vmem [shape: f32[1,128], index: 10, kind: input, shape index: {}]   ;;  %s1250_s11 = inlined_call_operand.vmem [shape: bf16[16,128], index: 11, kind: output, shape index: {}]  }
   0x1   :  { %17 = vsyncpa [#allocation5], 0 }
   0x2   :  { %18 = vsyncpa [#allocation8], 0  ;;  %s1038_s17 = smov [#allocation4]   ;;  %s1039_s19 = smov [#allocation2]  }
   0x3   :  { %s44_s18 = sshll.u32 %s1038_s17, 4  ;;  %s30_s20 = sshll.u32 %s1039_s19, 4  ;;  %s45_s18 = int_to_ptr.vmem [resolvable:$true] %s44_s18  ;;  %s1108_s20 = int_to_ptr.vmem [resolvable:$true] %s30_s20 }
   0x4   :  { %s944_s23 = scalar_lea.hbm %s1244_s5, 1024 }
   0x5   :  { %p945_p0 = scmp.ne.s32.totalorder %s1244_s5, %s944_s23  ;;  %p948_p1 = scmp.lt.u32.totalorder %s944_s23, %s1244_s5 }
   0x7   :  { %p950_p2 = pnand %p948_p1, %p945_p0 }
   0x9   :  { %953 = shalt.err (!%p950_p2)
}
   0xa   :  { %s954_s28 = scalar_lea.vmem %s45_s18, 1024  ;;  %p959_p4 = scmp.lt.s32.totalorder %s45_s18, %s45_s18 }
   0xb   :  { %p955_p3 = scmp.ne.s32.totalorder %s45_s18, %s954_s28  ;;  %p960_p5 = scmp.lt.s32.totalorder %s954_s28, %s954_s28 }
   0xd   :  { %p961_p6 = por %p960_p5, %p959_p4 }
   0xf   :  { %p962_p7 = pnand %p961_p6, %p955_p3 }
  0x11   :  { %965 = shalt.err (!%p962_p7)
}
  0x12   :  { %s1040_s29 = smov 64   ;;  %s1041_s30 = smov 4  }
  0x13   :  { %50 = dma.hbm_to_vmem [thread:$0]  %s1244_s5, 1024, %s45_s18, [#allocation5], %s1040_s29, %s1040_s29, %s1041_s30  }
  0x14   :  { %s966_s16 = scalar_lea.hbm %s1242_s3, 2048 }
  0x15   :  { %p967_p8 = scmp.ne.s32.totalorder %s1242_s3, %s966_s16  ;;  %p970_p9 = scmp.lt.u32.totalorder %s966_s16, %s1242_s3 }
  0x17   :  { %p972_p10 = pnand %p970_p9, %p967_p8 }
  0x19   :  { %975 = shalt.err (!%p972_p10)
}
  0x1a   :  { %s976_s23 = scalar_lea.vmem %s1108_s20, 2048  ;;  %p981_p12 = scmp.lt.s32.totalorder %s1108_s20, %s1108_s20 }
  0x1b   :  { %p977_p11 = scmp.ne.s32.totalorder %s1108_s20, %s976_s23  ;;  %p982_p13 = scmp.lt.s32.totalorder %s976_s23, %s976_s23 }
  0x1d   :  { %p983_p0 = por %p982_p13, %p981_p12 }
  0x1f   :  { %p984_p1 = pnand %p983_p0, %p977_p11 }
  0x21   :  { %987 = shalt.err (!%p984_p1)
}
  0x22   :  { %36 = dma.hbm_to_vmem [thread:$0]  %s1242_s3, 2048, %s1108_s20, [#allocation3], %s1040_s29, %s1040_s29, %s1041_s30  }
  0x23   :  { %s1042_s24 = smov [#allocation6]   ;;  %s1043_s26 = smov [#allocation7]  }
  0x24   :  { %s58_s25 = sshll.u32 %s1042_s24, 4  ;;  %s72_s27 = sshll.u32 %s1043_s26, 4  ;;  %s59_s25 = int_to_ptr.vmem [resolvable:$true] %s58_s25  ;;  %s1145_s27 = int_to_ptr.vmem [resolvable:$true] %s72_s27 }
  0x25   :  { %s988_s13 = scalar_lea.hbm %s1246_s7, 1024 }
  0x26   :  { %p989_p2 = scmp.ne.s32.totalorder %s1246_s7, %s988_s13  ;;  %p992_p3 = scmp.lt.u32.totalorder %s988_s13, %s1246_s7 }
  0x28   :  { %p994_p4 = pnand %p992_p3, %p989_p2 }
  0x2a   :  { %997 = shalt.err (!%p994_p4)
}
  0x2b   :  { %s998_s3 = scalar_lea.vmem %s59_s25, 1024  ;;  %p1003_p6 = scmp.lt.s32.totalorder %s59_s25, %s59_s25 }
  0x2c   :  { %p999_p5 = scmp.ne.s32.totalorder %s59_s25, %s998_s3  ;;  %p1004_p7 = scmp.lt.s32.totalorder %s998_s3, %s998_s3 }
  0x2e   :  { %p1005_p8 = por %p1004_p7, %p1003_p6 }
  0x30   :  { %p1006_p9 = pnand %p1005_p8, %p999_p5 }
  0x32   :  { %1009 = shalt.err (!%p1006_p9)
}
  0x33   :  { %64 = dma.hbm_to_vmem [thread:$0]  %s1246_s7, 1024, %s59_s25, [#allocation5], %s1040_s29, %s1040_s29, %s1041_s30  }
  0x34   :  { %s1010_s23 = scalar_lea.hbm %s1248_s9, 1024 }
  0x35   :  { %p1011_p10 = scmp.ne.s32.totalorder %s1248_s9, %s1010_s23  ;;  %p1014_p11 = scmp.lt.u32.totalorder %s1010_s23, %s1248_s9 }
  0x37   :  { %p1016_p12 = pnand %p1014_p11, %p1011_p10 }
  0x39   :  { %1019 = shalt.err (!%p1016_p12)
}
  0x3a   :  { %s1020_s28 = scalar_lea.vmem %s1145_s27, 1024  ;;  %p1025_p0 = scmp.lt.s32.totalorder %s1145_s27, %s1145_s27 }
  0x3b   :  { %p1021_p13 = scmp.ne.s32.totalorder %s1145_s27, %s1020_s28  ;;  %p1026_p1 = scmp.lt.s32.totalorder %s1020_s28, %s1020_s28 }
  0x3d   :  { %p1027_p2 = por %p1026_p1, %p1025_p0 }
  0x3f   :  { %p1028_p3 = pnand %p1027_p2, %p1021_p13 }
  0x41   :  { %1031 = shalt.err (!%p1028_p3)
}
  0x42   :  { %78 = dma.hbm_to_vmem [thread:$0]  %s1248_s9, 1024, %s1145_s27, [#allocation8], %s1040_s29, %s1040_s29, %s1041_s30  }
  0x43   :  { %1032 = dma.done.wait [#allocation3], 2048  }
  0x44   :  { %1033 = vsyncadd [#allocation3], 4294965248 }
  0x45   :  { %1034 = dma.done.wait [#allocation5], 2048  }
  0x46   :  { %1035 = vsyncadd [#allocation5], 4294965248 }
  0x47   :  { %1036 = dma.done.wait [#allocation8], 1024  }
  0x48   :  { %1037 = vsyncadd [#allocation8], 4294966272  ;;  %vm127_vm0 = vcmask 1043456   ;;  %v1044_v0 = vmov 0   ;;  %vm128_vm1 = vcmask 1044480   ;;  %v1045_v1 = vmov 65535  }
  0x49   :  { %169 = vmatprep.mubr.bf16.mxu0 %v1044_v0  ;;  %v129_v2 = vsel %vm127_vm0, 4294967295, %v1045_v1  ;;  %v900_v4 = vld [vmem:[%s1240_s1 + $0x4] ss:$8 sps:$4 sm:$0x1f]   ;;  %vm123_vm2 = vcmask 72704   ;;  %v908_v13 = vld [vmem:[#allocation2 + $0x50] sm:$0xff]   ;;  %v100_v31 = vlaneseq }
  0x4a   :  { %v130_v3 = vsel %vm128_vm1, %v129_v2, 0  ;;  %v902_v5 = vld [vmem:[%s1240_s1] ss:$8 sps:$4 sm:$0x1f]   ;;  %v909_v14 = vld [vmem:[#allocation2 + $0x10] sm:$0xff]   ;;  %v910_v15 = vld [vmem:[#allocation2 + $0x58] sm:$0xff]  }
  0x4b   :  { %v135_v6 = vand.u32 %v900_v4, %v130_v3  ;;  %v903_v7 = vld [vmem:[%s1239_s0] sm:$0xff]   ;;  %v132_v8 = vand.u32 %v902_v5, %v130_v3  ;;  %v906_v11 = vld [vmem:[#allocation2 + $0x48] sm:$0xff]   ;;  %v911_v16 = vld [vmem:[#allocation2 + $0x18] sm:$0xff]   ;;  %v1046_v26 = vmov 0.0   ;;  %v101_v32 = vshrl.u32 %v100_v31, 7 }
  0x4c   :  { %v904_v9 = vld [vmem:[#allocation2 + $0x40] sm:$0xff]   ;;  %v907_v12 = vld [vmem:[#allocation2 + $0x8] sm:$0xff]   ;;  %v916_v21 = vld [vmem:[#allocation2 + $0x70] sm:$0xff]   ;;  %vm1047_vm3 = vmmov 0  }
  0x4d   :  { %137 = vmatprep.subr.bf16.mxu0 %v135_v6  ;;  %v905_v10 = vld [vmem:[#allocation2] sm:$0xff]   ;;  %781 = vmatprep.subr.bf16.mxu1 %v904_v9  ;;  %v914_v19 = vld [vmem:[#allocation2 + $0x68] sm:$0xff]   ;;  %v917_v22 = vld [vmem:[#allocation2 + $0x30] sm:$0xff]   ;;  %v102_v33 = vsub.s32 0, %v101_v32  ;;  %v106_v35 = vsub.s32 1, %v101_v32 }
  0x4e   :  { %138 = vmatpush1.bf16.msra.mxu0 %v132_v8  ;;  %782 = vmatpush3.bf16.msra.mxu1 %v905_v10  ;;  %v912_v17 = vld [vmem:[#allocation2 + $0x60] sm:$0xff]   ;;  %v915_v20 = vld [vmem:[#allocation2 + $0x28] sm:$0xff]   ;;  %v918_v23 = vld [vmem:[#allocation2 + $0x78] sm:$0xff]  }
  0x4f   :  { %783 = vmatprep.subr.bf16.mxu1 %v906_v11  ;;  %v913_v18 = vld [vmem:[#allocation2 + $0x20] sm:$0xff]   ;;  %v919_v24 = vld [vmem:[#allocation2 + $0x38] sm:$0xff]   ;;  %830 = vmatprep.subr.bf16.mxu0 %v1046_v26  ;;  %v921_v27 = vld [vmem:[#allocation4 + $0x8] sm:$0xff]  }
  0x50   :  { %v920_v25 = vld [vmem:[#allocation4] sm:$0xff]   ;;  %v922_v28 = vld [vmem:[#allocation4 + $0x10] sm:$0xff]   ;;  %v923_v29 = vld [vmem:[#allocation4 + $0x18] sm:$0xff]  }
  0x51   :  { %727 = vmatmul.mubr.msk.bf16.vlgmr.msra.gmra.mrb[0].mxu0 %vm123_vm2, %v903_v7  ;;  %v924_v30 = vld [vmem:[#allocation4 + $0x20] sm:$0xff]   ;;  %v925_v52 = vld [vmem:[#allocation4 + $0x28] sm:$0xff]   ;;  %v926_v53 = vld [vmem:[#allocation4 + $0x30] sm:$0xff]  }
  0x52   :  { %784 = vmatpush3.bf16.msra.mxu1 %v907_v12  ;;  %831 = vmatpush3.bf16.msra.mxu0 %v920_v25  ;;  %v98_v34 = vld [vmem:[%s1241_s2] sm:$0x3]  ;;  %v927_v54 = vld [vmem:[#allocation4 + $0x38] sm:$0xff]   ;;  %v929_v56 = vld [vmem:[#allocation6 + $0x8] sm:$0xff]  }
  0x53   :  { %785 = vmatprep.subr.bf16.mxu1 %v908_v13  ;;  %832 = vmatprep.subr.bf16.mxu0 %v1046_v26  ;;  %v103_v36 = vrot.slane %v98_v34, %v102_v33  ;;  %v107_v37 = vrot.slane %v98_v34, %v106_v35  ;;  %v928_v55 = vld [vmem:[#allocation6] sm:$0xff]   ;;  %v930_v57 = vld [vmem:[#allocation6 + $0x10] sm:$0xff]   ;;  %v931_v58 = vld [vmem:[#allocation6 + $0x18] sm:$0xff]  }
  0x54   :  { %846 = vmatprep.mubr.msk.bf16.mxu0 %vm1047_vm3, %v1046_v26  ;;  %v932_v59 = vld [vmem:[#allocation6 + $0x20] sm:$0xff]   ;;  %v933_v60 = vld [vmem:[#allocation6 + $0x28] sm:$0xff]   ;;  %v934_v9 = vld [vmem:[#allocation6 + $0x30] sm:$0xff]  }
  0x55   :  { %v728_v62 = vld [vmem:[%s1243_s4] ss:$0 sm:$0xff]  ;;  %v935_v10 = vld [vmem:[#allocation6 + $0x38] sm:$0xff]   ;;  %v937_v12 = vld [vmem:[#allocation7 + $0x8] sm:$0xff]  }
  0x56   :  { %786 = vmatpush3.bf16.msra.mxu1 %v909_v14  ;;  %833 = vmatpush3.bf16.msra.mxu0 %v921_v27  ;;  %v936_v11 = vld [vmem:[#allocation7] sm:$0xff]   ;;  %v938_v13 = vld [vmem:[#allocation7 + $0x10] sm:$0xff]   ;;  %v939_v14 = vld [vmem:[#allocation7 + $0x18] sm:$0xff]  }
  0x57   :  { %787 = vmatprep.subr.bf16.mxu1 %v910_v15  ;;  %834 = vmatprep.subr.bf16.mxu0 %v1046_v26  ;;  %v940_v15 = vld [vmem:[#allocation7 + $0x20] sm:$0xff]  }
  0x5a   :  { %788 = vmatpush3.bf16.msra.mxu1 %v911_v16  ;;  %835 = vmatpush3.bf16.msra.mxu0 %v922_v28  ;;  %v941_v16 = vld [vmem:[#allocation7 + $0x28] sm:$0xff]   ;;  %v942_v28 = vld [vmem:[#allocation7 + $0x30] sm:$0xff]  }
  0x5b   :  { %789 = vmatprep.subr.bf16.mxu1 %v912_v17  ;;  %836 = vmatprep.subr.bf16.mxu0 %v1046_v26  ;;  %v745_v17 = vld [vmem:[%s1245_s6] ss:$0 sm:$0xff] }
  0x5e   :  { %790 = vmatpush3.bf16.msra.mxu1 %v913_v18  ;;  %837 = vmatpush3.bf16.msra.mxu0 %v923_v29  ;;  %v943_v29 = vld [vmem:[#allocation7 + $0x38] sm:$0xff]  }
  0x5f   :  { %791 = vmatprep.subr.bf16.mxu1 %v914_v19  ;;  %838 = vmatprep.subr.bf16.mxu0 %v1046_v26 }
  0x62   :  { %792 = vmatpush3.bf16.msra.mxu1 %v915_v20  ;;  %839 = vmatpush3.bf16.msra.mxu0 %v924_v30  ;;  %v754_v30 = vld [vmem:[%s1247_s8] ss:$0 sm:$0xff] }
  0x63   :  { %793 = vmatprep.subr.bf16.mxu1 %v916_v21  ;;  %840 = vmatprep.subr.bf16.mxu0 %v1046_v26 }
  0x66   :  { %794 = vmatpush3.bf16.msra.mxu1 %v917_v22  ;;  %841 = vmatpush3.bf16.msra.mxu0 %v925_v52 }
  0x67   :  { %795 = vmatprep.subr.bf16.mxu1 %v918_v23  ;;  %842 = vmatprep.subr.bf16.mxu0 %v1046_v26 }
  0x6a   :  { %796 = vmatpush3.bf16.msra.mxu1 %v919_v24  ;;  %843 = vmatpush3.bf16.msra.mxu0 %v926_v53 }
  0x6b   :  { %850 = vmatprep.subr.bf16.mxu1 %v1046_v26  ;;  %844 = vmatprep.subr.bf16.mxu0 %v1046_v26 }
  0x6e   :  { %845 = vmatpush3.bf16.msra.mxu0 %v927_v54 }
  0x6f   :  { %870 = vmatprep.subr.bf16.mxu0 %v1046_v26 }
 0x124   :  { %v171_v38 = vpop.f32.mrb[0].mxu0 }
 0x125   :  { %v172_v39 = vadd.f32 %v171_v38, %v103_v36  ;;  %v173_v40 = vpop.f32.mrb[1].mxu0 }
 0x126   :  { %v174_v41 = vadd.f32 %v173_v40, %v107_v37  ;;  %v175_v42 = vpop.f32.mrb[2].mxu0 }
 0x127   :  { %v176_v43 = vadd.f32 %v175_v42, %v103_v36  ;;  %v177_v44 = vpop.f32.mrb[3].mxu0  ;;  %v180_v46 = vmax.f32 %v172_v39, 0.0 }
 0x128   :  { %v178_v45 = vadd.f32 %v177_v44, %v107_v37  ;;  %v181_v48 = vmax.f32 %v174_v41, 0.0 }
 0x129   :  { %v182_v47 = vmax.f32 %v176_v43, 0.0 }
 0x12a   :  { %v183_v49 = vmax.f32 %v178_v45, 0.0 }
 0x12b   :  { %v184_v50 = vpack.c.bf16 %v182_v47, %v180_v46 }
 0x12c   :  { %v185_v51 = vpack.c.bf16 %v183_v49, %v181_v48 }
 0x12e   :  { %353 = vmatprep.mubr.bf16.mxu1 %v185_v51 }
 0x12f   :  { %354 = vmatmul.mubr.bf16.vlgmr.msra.gmra.mrb[0].mxu1 %v184_v50 }
 0x130   :  { %866 = vmatprep.mubr.msk.bf16.mxu1 %vm1047_vm3, %v1046_v26  ;;  %851 = vmatpush3.bf16.msra.mxu1 %v928_v55 }
 0x131   :  { %852 = vmatprep.subr.bf16.mxu1 %v1046_v26 }
 0x134   :  { %853 = vmatpush3.bf16.msra.mxu1 %v929_v56 }
 0x135   :  { %854 = vmatprep.subr.bf16.mxu1 %v1046_v26 }
 0x138   :  { %855 = vmatpush3.bf16.msra.mxu1 %v930_v57 }
 0x139   :  { %856 = vmatprep.subr.bf16.mxu1 %v1046_v26 }
 0x13c   :  { %857 = vmatpush3.bf16.msra.mxu1 %v931_v58 }
 0x13d   :  { %858 = vmatprep.subr.bf16.mxu1 %v1046_v26 }
 0x140   :  { %859 = vmatpush3.bf16.msra.mxu1 %v932_v59 }
 0x141   :  { %860 = vmatprep.subr.bf16.mxu1 %v1046_v26 }
 0x144   :  { %861 = vmatpush3.bf16.msra.mxu1 %v933_v60 }
 0x145   :  { %862 = vmatprep.subr.bf16.mxu1 %v1046_v26 }
 0x148   :  { %863 = vmatpush3.bf16.msra.mxu1 %v934_v9 }
 0x149   :  { %864 = vmatprep.subr.bf16.mxu1 %v1046_v26 }
 0x14c   :  { %865 = vmatpush3.bf16.msra.mxu1 %v935_v10 }
 0x202   :  { %v797_v61 = vpop.f32.mrb[0].mxu1 }
 0x203   :  { %v798_v63 = vpop.f32.mrb[1].mxu1 }
 0x204   :  { %v799_v0 = vadd.f32 %v798_v63, %v797_v61  ;;  %v800_v1 = vpop.f32.mrb[2].mxu1 }
 0x205   :  { %v801_v2 = vpop.f32.mrb[3].mxu1 }
 0x206   :  { %v356_v3 = vadd.f32 %v799_v0, %v728_v62  ;;  %v802_v4 = vadd.f32 %v801_v2, %v800_v1 }
 0x208   :  { %v359_v5 = vadd.f32 %v802_v4, %v728_v62  ;;  %v362_v6 = vmax.f32 %v356_v3, 0.0 }
 0x20a   :  { %v363_v7 = vmax.f32 %v359_v5, 0.0 }
 0x20c   :  { %v364_v8 = vpack.c.bf16 %v363_v7, %v362_v6 }
 0x20e   :  { %847 = vmatmul.mubr.bf16.vlgmr.msra.gmra.mrb[4].mxu0 %v364_v8 }
 0x20f   :  { %886 = vmatprep.mubr.msk.bf16.mxu0 %vm1047_vm3, %v1046_v26  ;;  %871 = vmatpush3.bf16.msra.mxu0 %v936_v11 }
 0x210   :  { %872 = vmatprep.subr.bf16.mxu0 %v1046_v26 }
 0x213   :  { %873 = vmatpush3.bf16.msra.mxu0 %v937_v12 }
 0x214   :  { %874 = vmatprep.subr.bf16.mxu0 %v1046_v26 }
 0x217   :  { %875 = vmatpush3.bf16.msra.mxu0 %v938_v13 }
 0x218   :  { %876 = vmatprep.subr.bf16.mxu0 %v1046_v26 }
 0x21b   :  { %877 = vmatpush3.bf16.msra.mxu0 %v939_v14 }
 0x21c   :  { %878 = vmatprep.subr.bf16.mxu0 %v1046_v26 }
 0x21f   :  { %879 = vmatpush3.bf16.msra.mxu0 %v940_v15 }
 0x220   :  { %880 = vmatprep.subr.bf16.mxu0 %v1046_v26 }
 0x223   :  { %881 = vmatpush3.bf16.msra.mxu0 %v941_v16 }
 0x224   :  { %882 = vmatprep.subr.bf16.mxu0 %v1046_v26 }
 0x227   :  { %883 = vmatpush3.bf16.msra.mxu0 %v942_v28 }
 0x228   :  { %884 = vmatprep.subr.bf16.mxu0 %v1046_v26  ;;  %v763_v26 = vld [vmem:[%s1249_s10] ss:$0 sm:$0xff] }
 0x22b   :  { %885 = vmatpush3.bf16.msra.mxu0 %v943_v29 }
 0x2e1   :  { %v470_v18 = vpop.f32.mrb[4].mxu0 }
 0x2e2   :  { %v471_v19 = vadd.f32 %v745_v17, %v470_v18  ;;  %v848_v20 = vpop.f32.mrb[5].mxu0 }
 0x2e3   :  { %v473_v21 = vpop.f32.mrb[6].mxu0 }
 0x2e4   :  { %v474_v22 = vadd.f32 %v745_v17, %v473_v21  ;;  %v849_v23 = vpop.f32.mrb[7].mxu0  ;;  %v477_v24 = vmax.f32 %v471_v19, 0.0 }
 0x2e6   :  { %v478_v25 = vmax.f32 %v474_v22, 0.0 }
 0x2e8   :  { %v479_v27 = vpack.c.bf16 %v478_v25, %v477_v24 }
 0x2ea   :  { %867 = vmatmul.mubr.bf16.vlgmr.msra.gmra.mrb[4].mxu1 %v479_v27 }
 0x3bd   :  { %v585_v31 = vpop.f32.mrb[4].mxu1 }
 0x3be   :  { %v586_v32 = vadd.f32 %v754_v30, %v585_v31  ;;  %v868_v33 = vpop.f32.mrb[5].mxu1 }
 0x3bf   :  { %v588_v34 = vpop.f32.mrb[6].mxu1 }
 0x3c0   :  { %v589_v35 = vadd.f32 %v754_v30, %v588_v34  ;;  %v869_v36 = vpop.f32.mrb[7].mxu1  ;;  %v592_v37 = vmax.f32 %v586_v32, 0.0 }
 0x3c2   :  { %v593_v38 = vmax.f32 %v589_v35, 0.0 }
 0x3c4   :  { %v594_v39 = vpack.c.bf16 %v593_v38, %v592_v37 }
 0x3c6   :  { %887 = vmatmul.mubr.bf16.vlgmr.msra.gmra.mrb[8].mxu0 %v594_v39 }
 0x499   :  { %v700_v40 = vpop.f32.mrb[8].mxu0 }
 0x49a   :  { %v888_v41 = vpop.f32.mrb[9].mxu0  ;;  %v701_v43 = vadd.f32 %v763_v26, %v700_v40 }
 0x49b   :  { %v703_v42 = vpop.f32.mrb[10].mxu0 }
 0x49c   :  { %v704_v44 = vadd.f32 %v763_v26, %v703_v42  ;;  %v889_v45 = vpop.f32.mrb[11].mxu0 }
 0x49e   :  { %v779_v46 = vpack.c.bf16 %v704_v44, %v701_v43 }
 0x4a0   :  { %780 = vst [vmem:[%s1250_s11] sm:$0xff] %v779_v46  }
 0x4a1   :  { %721 = vsyncpa [#allocation3], 1 }
 0x4a2   :  { %722 = vsyncpa [#allocation5], 1 }
 0x4a3   :  { %723 = vsyncpa [#allocation8], 1 }

</bundles_post_ra>
